<compile_context>
chip_gen: v7x
topology: tpu7x:2x2x1
jax: 0.10.0
libtpu: 0.0.40
codegen_flags: <defaults>
</compile_context>

<pallas_src>
import functools

import jax
import jax.numpy as jnp
from jax.experimental import pallas as pl
from jax.experimental.pallas import tpu as pltpu


def _round_up(x, m):
    return ((x + m - 1) // m) * m


def _kldiv_kernel(ys_ref, yt_ref, out_ref, *, temperature):
    inv_t = 1.0 / temperature
    s = ys_ref[...].astype(jnp.float32) * inv_t
    t = yt_ref[...].astype(jnp.float32) * inv_t

    # log_softmax(student / T) along class dim (last axis), numerically stable.
    s_shift = s - jnp.max(s, axis=-1, keepdims=True)
    sum_s = jnp.sum(jnp.exp(s_shift), axis=-1, keepdims=True)
    log_p_s = s_shift - jnp.log(sum_s)

    # softmax(teacher / T) and its log, reusing exp(t_shift) (2 exps/elem, not 3).
    t_shift = t - jnp.max(t, axis=-1, keepdims=True)
    e_t = jnp.exp(t_shift)
    sum_t = jnp.sum(e_t, axis=-1, keepdims=True)
    log_p_t = t_shift - jnp.log(sum_t)
    # Exact per-row reciprocal (only block_rows values — negligible cost).
    p_t = e_t * pl.reciprocal(sum_t, approx=False)

    # F.kl_div(log_p_s, p_t) summand = p_t * (log p_t - log p_s)
    term = p_t * (log_p_t - log_p_s)

    # Per-class (lane-dense) partial sums for this row block; cross-block and
    # cross-class reduction is a tiny JAX sum outside the kernel. Keeping the
    # output per-block makes the grid axis fully "parallel" (megacore on v7x).
    out_ref[0, ...] = jnp.sum(term, axis=0, keepdims=True)


def kldiv_loss(y_s, y_t, temperature=4.0, block_rows=None,
               vmem_budget_bytes=32 * 1024 * 1024):
    """KL-divergence distillation loss (batchmean * T**2) as a Pallas TPU kernel.

    y_s, y_t: (B, C) student / teacher logits (f32 or bf16).
    Returns a scalar float32 loss matching the PyTorch KLDiv module.
    """
    assert y_s.shape == y_t.shape and y_s.ndim == 2
    B, C = y_s.shape
    itemsize = jnp.dtype(y_s.dtype).itemsize
    # Minimum sublane granularity for packed dtypes: f32→8, bf16→16, 8-bit→32.
    sublane = {4: 8, 2: 16, 1: 32}.get(itemsize, 8)

    if block_rows is None:
        # 2 inputs × 2 pipeline buffers × row × C × itemsize must fit the budget.
        per_row_bytes = 2 * 2 * C * itemsize
        rows = vmem_budget_bytes // per_row_bytes
        rows = min(rows, 2048)
        rows = (rows // sublane) * sublane
        if rows < sublane:
            # TODO(synk): add class-dim (online log-sum-exp) tiling for vocab-scale C.
            raise NotImplementedError(
                f"C={C} too large for a full-class-dim row tile in VMEM")
        block_rows = min(rows, _round_up(B, sublane))
    block_rows = max(sublane, (block_rows // sublane) * sublane)

    # Pad batch to a multiple of block_rows. Zero-padded rows have identical
    # (uniform) student/teacher softmaxes -> they contribute exactly 0 to the
    # KL sum, and we divide by the true B below.
    B_pad = _round_up(B, block_rows)
    if B_pad != B:
        y_s = jnp.pad(y_s, ((0, B_pad - B), (0, 0)))
        y_t = jnp.pad(y_t, ((0, B_pad - B), (0, 0)))

    num_blocks = B_pad // block_rows
    kernel = functools.partial(_kldiv_kernel, temperature=float(temperature))

    footprint = 2 * 2 * block_rows * C * itemsize + 2 * 1 * C * 4
    vmem_limit = int(max(48 * 1024 * 1024, footprint + 8 * 1024 * 1024))

    partials = pl.pallas_call(
        kernel,
        out_shape=jax.ShapeDtypeStruct((num_blocks, 1, C), jnp.float32),
        grid_spec=pltpu.PrefetchScalarGridSpec(
            num_scalar_prefetch=0,
            grid=(num_blocks,),
            in_specs=[
                pl.BlockSpec((block_rows, C), lambda i: (i, 0)),
                pl.BlockSpec((block_rows, C), lambda i: (i, 0)),
            ],
            out_specs=pl.BlockSpec((1, 1, C), lambda i: (i, 0, 0)),
        ),
        compiler_params=pltpu.CompilerParams(
            dimension_semantics=("parallel",),
            vmem_limit_bytes=vmem_limit,
        ),
        cost_estimate=pl.CostEstimate(
            flops=8 * B_pad * C,
            transcendentals=2 * B_pad * C,
            bytes_accessed=2 * B_pad * C * itemsize + num_blocks * C * 4,
        ),
    )(y_s, y_t)

    # reduction='batchmean' -> divide by the ORIGINAL batch size, then * T**2.
    return jnp.sum(partials) * (temperature * temperature) / B


def _kldiv_ref(y_s, y_t, temperature):
    """Pure-JAX reference matching the PyTorch semantics."""
    s = y_s.astype(jnp.float32) / temperature
    t = y_t.astype(jnp.float32) / temperature
    log_p_s = jax.nn.log_softmax(s, axis=1)
    log_p_t = jax.nn.log_softmax(t, axis=1)
    p_t = jnp.exp(log_p_t)
    kl = jnp.sum(p_t * (log_p_t - log_p_s)) / y_s.shape[0]
    return kl * temperature**2


if __name__ == "__main__":
    T = 4.0
    key = jax.random.PRNGKey(0)
    k1, k2, k3, k4 = jax.random.split(key, 4)

    # Case 1: small f32 problem (exact tile multiple).
    B, C = 16, 128
    y_s = jax.random.normal(k1, (B, C), dtype=jnp.float32)
    y_t = jax.random.normal(k2, (B, C), dtype=jnp.float32)
    loss = jax.block_until_ready(kldiv_loss(y_s, y_t, temperature=T))
    ref = _kldiv_ref(y_s, y_t, T)
    assert jnp.allclose(loss, ref, rtol=1e-5, atol=1e-5), (loss, ref)

    # Case 2: ragged batch + bf16 inputs (exercises zero-padding and the
    # 16-row sublane packing requirement for bf16 tiles).
    B2, C2 = 10, 256
    y_s2 = jax.random.normal(k3, (B2, C2), dtype=jnp.bfloat16)
    y_t2 = jax.random.normal(k4, (B2, C2), dtype=jnp.bfloat16)
    loss2 = jax.block_until_ready(kldiv_loss(y_s2, y_t2, temperature=T))
    ref2 = _kldiv_ref(y_s2, y_t2, T)
    assert jnp.allclose(loss2, ref2, rtol=1e-4, atol=1e-4), (loss2, ref2)

    print("KERNEL_OK")
</pallas_src>

<mosaic_0001>
module attributes {stable_mosaic.version = 11 : i64} {
  func.func @_kldiv_kernel(%arg0: i32, %arg1: memref<16x128xf32, #tpu.memory_space<vmem>>, %arg2: memref<16x128xf32, #tpu.memory_space<vmem>>, %arg3: memref<1x1x128xf32, #tpu.memory_space<vmem>>) attributes {dimension_semantics = [#tpu.dimension_semantics<parallel>], iteration_bounds = array<i64: 1>, scalar_prefetch = 0 : i64, scratch_operands = 0 : i64, tpu.core_type = #tpu.core_type<tc>, window_params = [{transform_indices = @transform_0, window_bounds = array<i64: 16, 128>}, {transform_indices = @transform_1, window_bounds = array<i64: 16, 128>}, {transform_indices = @transform_2, window_bounds = array<i64: 1, 1, 128>}]} {
    %c0 = arith.constant 0 : index
    %c0_0 = arith.constant 0 : index
    %0 = vector.load %arg1[%c0, %c0_0] : memref<16x128xf32, #tpu.memory_space<vmem>>, vector<16x128xf32>
    %cst = arith.constant 2.500000e-01 : f32
    %1 = vector.broadcast %cst : f32 to vector<16x128xf32>
    %2 = arith.mulf %0, %1 : vector<16x128xf32>
    %c0_1 = arith.constant 0 : index
    %c0_2 = arith.constant 0 : index
    %3 = vector.load %arg2[%c0_1, %c0_2] : memref<16x128xf32, #tpu.memory_space<vmem>>, vector<16x128xf32>
    %cst_3 = arith.constant 2.500000e-01 : f32
    %4 = vector.broadcast %cst_3 : f32 to vector<16x128xf32>
    %5 = arith.mulf %3, %4 : vector<16x128xf32>
    %cst_4 = arith.constant dense<0xFF800000> : vector<16xf32>
    %6 = vector.multi_reduction <maximumf>, %2, %cst_4 [1] : vector<16x128xf32> to vector<16xf32>
    %7 = vector.shape_cast %6 : vector<16xf32> to vector<16x1xf32>
    %8 = vector.broadcast %7 : vector<16x1xf32> to vector<16x128xf32>
    %9 = arith.subf %2, %8 : vector<16x128xf32>
    %10 = math.exp %9 : vector<16x128xf32>
    %cst_5 = arith.constant dense<0.000000e+00> : vector<16xf32>
    %11 = vector.multi_reduction <add>, %10, %cst_5 [1] : vector<16x128xf32> to vector<16xf32>
    %12 = vector.shape_cast %11 : vector<16xf32> to vector<16x1xf32>
    %13 = math.log %12 : vector<16x1xf32>
    %14 = vector.broadcast %13 : vector<16x1xf32> to vector<16x128xf32>
    %15 = arith.subf %9, %14 : vector<16x128xf32>
    %cst_6 = arith.constant dense<0xFF800000> : vector<16xf32>
    %16 = vector.multi_reduction <maximumf>, %5, %cst_6 [1] : vector<16x128xf32> to vector<16xf32>
    %17 = vector.shape_cast %16 : vector<16xf32> to vector<16x1xf32>
    %18 = vector.broadcast %17 : vector<16x1xf32> to vector<16x128xf32>
    %19 = arith.subf %5, %18 : vector<16x128xf32>
    %20 = math.exp %19 : vector<16x128xf32>
    %cst_7 = arith.constant dense<0.000000e+00> : vector<16xf32>
    %21 = vector.multi_reduction <add>, %20, %cst_7 [1] : vector<16x128xf32> to vector<16xf32>
    %22 = vector.shape_cast %21 : vector<16xf32> to vector<16x1xf32>
    %23 = math.log %22 : vector<16x1xf32>
    %24 = vector.broadcast %23 : vector<16x1xf32> to vector<16x128xf32>
    %25 = arith.subf %19, %24 : vector<16x128xf32>
    %26 = tpu.reciprocal %22 : vector<16x1xf32> -> vector<16x1xf32>
    %27 = vector.broadcast %26 : vector<16x1xf32> to vector<16x128xf32>
    %28 = arith.mulf %20, %27 : vector<16x128xf32>
    %29 = arith.subf %25, %15 : vector<16x128xf32>
    %30 = arith.mulf %28, %29 : vector<16x128xf32>
    %cst_8 = arith.constant dense<0.000000e+00> : vector<128xf32>
    %31 = vector.multi_reduction <add>, %30, %cst_8 [0] : vector<16x128xf32> to vector<128xf32>
    %32 = vector.shape_cast %31 : vector<128xf32> to vector<1x128xf32>
    %c0_9 = arith.constant 0 : index
    %c0_10 = arith.constant 0 : index
    %c0_11 = arith.constant 0 : index
    %33 = vector.load %arg3[%c0_9, %c0_10, %c0_11] : memref<1x1x128xf32, #tpu.memory_space<vmem>>, vector<1x1x128xf32>
    %34 = vector.shape_cast %33 : vector<1x1x128xf32> to vector<1x128xf32>
    %35 = vector.shape_cast %32 : vector<1x128xf32> to vector<1x1x128xf32>
    tpu.vector_store %arg3[%c0_9, %c0_10, %c0_11], %35 {strides = array<i32>} : memref<1x1x128xf32, #tpu.memory_space<vmem>>, vector<1x1x128xf32>,
    return
  }
  func.func @transform_0(%arg0: i32) -> (i32, i32) {
    %c0_i32 = arith.constant 0 : i32
    %c0_i32_0 = arith.constant 0 : i32
    return %arg0, %c0_i32 : i32, i32
  }
  func.func @transform_1(%arg0: i32) -> (i32, i32) {
    %c0_i32 = arith.constant 0 : i32
    %c0_i32_0 = arith.constant 0 : i32
    return %arg0, %c0_i32 : i32, i32
  }
  func.func @transform_2(%arg0: i32) -> (i32, i32, i32) {
    %c0_i32 = arith.constant 0 : i32
    %c0_i32_0 = arith.constant 0 : i32
    %c0_i32_1 = arith.constant 0 : i32
    return %arg0, %c0_i32, %c0_i32_0 : i32, i32, i32
  }
}

</mosaic_0001>

<bundles_post_ra>
// kernel: tpu_custom_call.1
= control target key start
LH: loop header
LB: loop body
LE: loop exit
PB: predicated region body
PF: predicated region fallthrough
CT: control target
= control target key end

     0   :  { %7 = vsyncpa [#allocation3], 0  ;;  %s273_s0 = inlined_call_operand.hbm [shape: f32[16,128], index: 0, kind: input, shape index: {}]   ;;  %s274_s1 = inlined_call_operand.hbm [shape: f32[16,128], index: 1, kind: input, shape index: {}]   ;;  %s275_s2 = inlined_call_operand.hbm [shape: f32[1,1,128], index: 2, kind: output, shape index: {}]  }
   0x1   :  { %8 = vsyncpa [#allocation6], 0 }
   0x2   :  { %9 = vsyncpa [#allocation4], 0  ;;  %s217_s9 = smov [#allocation2]   ;;  %s145_s13 = scalar_lea.hbm %s273_s0, 256 }
   0x3   :  { %s15_s10 = sshll.u32 %s217_s9, 4  ;;  %p146_p0 = scmp.ne.s32.totalorder %s273_s0, %s145_s13  ;;  %s16_s10 = int_to_ptr.vmem [resolvable:$true] %s15_s10 }
   0x4   :  { %p149_p1 = scmp.lt.u32.totalorder %s145_s13, %s273_s0 }
   0x6   :  { %p151_p2 = pnand %p149_p1, %p146_p0 }
   0x8   :  { %154 = shalt.err (!%p151_p2)
}
   0x9   :  { %s155_s18 = scalar_lea.vmem %s16_s10, 256  ;;  %p160_p4 = scmp.lt.s32.totalorder %s16_s10, %s16_s10 }
   0xa   :  { %p156_p3 = scmp.ne.s32.totalorder %s16_s10, %s155_s18  ;;  %p161_p5 = scmp.lt.s32.totalorder %s155_s18, %s155_s18 }
   0xc   :  { %p162_p6 = por %p161_p5, %p160_p4 }
   0xe   :  { %p163_p7 = pnand %p162_p6, %p156_p3 }
  0x10   :  { %166 = shalt.err (!%p163_p7)
}
  0x11   :  { %s218_s19 = smov 128   ;;  %s219_s20 = smov 8  }
  0x12   :  { %21 = dma.hbm_to_vmem [thread:$0]  %s273_s0, 256, %s16_s10, [#allocation3], %s218_s19, %s218_s19, %s219_s20  }
  0x13   :  { %s220_s23 = smov [#allocation5]   ;;  %s167_s27 = scalar_lea.hbm %s274_s1, 256 }
  0x14   :  { %s27_s24 = sshll.u32 %s220_s23, 4  ;;  %p168_p8 = scmp.ne.s32.totalorder %s274_s1, %s167_s27  ;;  %s28_s24 = int_to_ptr.vmem [resolvable:$true] %s27_s24 }
  0x15   :  { %p171_p9 = scmp.lt.u32.totalorder %s167_s27, %s274_s1 }
  0x17   :  { %p173_p10 = pnand %p171_p9, %p168_p8 }
  0x19   :  { %176 = shalt.err (!%p173_p10)
}
  0x1a   :  { %s177_s4 = scalar_lea.vmem %s28_s24, 256  ;;  %p182_p12 = scmp.lt.s32.totalorder %s28_s24, %s28_s24 }
  0x1b   :  { %p178_p11 = scmp.ne.s32.totalorder %s28_s24, %s177_s4  ;;  %p183_p13 = scmp.lt.s32.totalorder %s177_s4, %s177_s4 }
  0x1d   :  { %p184_p0 = por %p183_p13, %p182_p12 }
  0x1f   :  { %p185_p1 = pnand %p184_p0, %p178_p11 }
  0x21   :  { %188 = shalt.err (!%p185_p1)
}
  0x22   :  { %33 = dma.hbm_to_vmem [thread:$0]  %s274_s1, 256, %s28_s24, [#allocation6], %s218_s19, %s218_s19, %s219_s20  }
  0x23   :  { %211 = dma.done.wait [#allocation3], 256  }
  0x24   :  { %212 = vsyncadd [#allocation3], 4294967040 }
  0x25   :  { %213 = dma.done.wait [#allocation6], 256  }
  0x26   :  { %214 = vsyncadd [#allocation6], 4294967040  ;;  %v40_v0 = vld [vmem:[#allocation2] sm:$0xff]  ;;  %v44_v1 = vld [vmem:[#allocation5] sm:$0xff]  ;;  %s221_s1 = smov [#allocation7]  }
  0x27   :  { %v41_v2 = vld [vmem:[#allocation2 + $0x8] sm:$0xff]  ;;  %v42_v3 = vmul.f32 0.25, %v40_v0  ;;  %v46_v4 = vmul.f32 0.25, %v44_v1  ;;  %v45_v5 = vld [vmem:[#allocation5 + $0x8] sm:$0xff]  ;;  %s110_s6 = sshll.u32 %s221_s1, 4  ;;  %s111_s6 = int_to_ptr.vmem [resolvable:$true] %s110_s6 }
  0x28   :  { %v43_v6 = vmul.f32 0.25, %v41_v2  ;;  %v47_v7 = vmul.f32 0.25, %v45_v5  ;;  %s189_s7 = scalar_lea.vmem %s111_s6, 16  ;;  %s193_s8 = scalar_lea.vmem %s111_s6, 32 }
  0x29   :  { %48 = vmax.xlane.f32.xlu0 %v42_v3  ;;  %68 = vmax.xlane.f32.xlu1 %v46_v4  ;;  %p190_p2 = scmp.ne.s32.totalorder %s111_s6, %s189_s7  ;;  %p194_p3 = scmp.lt.s32.totalorder %s111_s6, %s111_s6 }
  0x2a   :  { %p195_p4 = scmp.lt.s32.totalorder %s193_s8, %s189_s7 }
  0x2c   :  { %p196_p5 = por %p195_p4, %p194_p3 }
  0x2d   :  { %50 = vmax.xlane.f32.xlu0 %v43_v6  ;;  %70 = vmax.xlane.f32.xlu1 %v47_v7 }
  0x2e   :  { %p197_p6 = pnand %p196_p5, %p190_p2 }
  0xb6   :  { %v49_v8 = vpop.xlane.xlu0 %48  ;;  %v69_v9 = vpop.xlane.xlu1 %68 }
  0xb7   :  { %v52_v10 = vsub.f32 %v42_v3, %v49_v8  ;;  %v72_v11 = vsub.f32 %v46_v4, %v69_v9 }
  0xb9   :  { %v54_v12 = vmul.f32 1.442695, %v52_v10  ;;  %v74_v13 = vmul.f32 1.442695, %v72_v11 }
  0xba   :  { %v51_v14 = vpop.xlane.xlu0 %50  ;;  %v71_v15 = vpop.xlane.xlu1 %70 }
  0xbb   :  { %125 = vpow2.f32 %v54_v12  ;;  %v53_v16 = vsub.f32 %v43_v6, %v51_v14  ;;  %v73_v17 = vsub.f32 %v47_v7, %v71_v15 }
  0xbc   :  { %127 = vpow2.f32 %v74_v13 }
  0xbd   :  { %v56_v18 = vmul.f32 1.442695, %v53_v16  ;;  %v76_v19 = vmul.f32 1.442695, %v73_v17 }
  0xbf   :  { %129 = vpow2.f32 %v56_v18 }
  0xc0   :  { %131 = vpow2.f32 %v76_v19 }
  0xc5   :  { %v126_v20 = vpop.eup %125 }
  0xc6   :  { %58 = vadd.xlane.f32.xlu0 %v126_v20  ;;  %v128_v21 = vpop.eup %127 }
  0xc9   :  { %v130_v22 = vpop.eup %129 }
  0xca   :  { %78 = vadd.xlane.f32.xlu0 %v128_v21  ;;  %60 = vadd.xlane.f32.xlu1 %v130_v22  ;;  %v132_v23 = vpop.eup %131 }
  0xce   :  { %80 = vadd.xlane.f32.xlu1 %v132_v23 }
 0x153   :  { %v59_v24 = vpop.xlane.xlu0 %58 }
 0x154   :  { %133 = vlog2.f32 %v59_v24 }
 0x157   :  { %v61_v25 = vpop.xlane.xlu1 %60  ;;  %v79_v26 = vpop.xlane.xlu0 %78 }
 0x158   :  { %135 = vlog2.f32 %v61_v25 }
 0x159   :  { %137 = vlog2.f32 %v79_v26 }
 0x15b   :  { %v81_v27 = vpop.xlane.xlu1 %80 }
 0x15c   :  { %139 = vlog2.f32 %v81_v27 }
 0x15d   :  { %141 = vrcp.f32 %v79_v26 }
 0x15e   :  { %143 = vrcp.f32 %v81_v27  ;;  %v134_v28 = vpop.eup %133 }
 0x15f   :  { %v63_v31 = vmul.f32 0.6931472, %v134_v28 }
 0x161   :  { %v66_v37 = vsub.f32 %v52_v10, %v63_v31 }
 0x162   :  { %v136_v29 = vpop.eup %135 }
 0x163   :  { %v138_v30 = vpop.eup %137  ;;  %v65_v33 = vmul.f32 0.6931472, %v136_v29 }
 0x164   :  { %v83_v32 = vmul.f32 0.6931472, %v138_v30 }
 0x165   :  { %v67_v40 = vsub.f32 %v53_v16, %v65_v33 }
 0x166   :  { %v140_v34 = vpop.eup %139  ;;  %v86_v35 = vsub.f32 %v72_v11, %v83_v32 }
 0x167   :  { %v142_v36 = vpop.eup %141  ;;  %v85_v38 = vmul.f32 0.6931472, %v140_v34 }
 0x168   :  { %v144_v39 = vpop.eup %143  ;;  %v92_v41 = vsub.f32 %v86_v35, %v66_v37  ;;  %v90_v43 = vmul.f32 %v142_v36, %v128_v21 }
 0x169   :  { %v87_v42 = vsub.f32 %v73_v17, %v85_v38  ;;  %v91_v44 = vmul.f32 %v144_v39, %v132_v23 }
 0x16a   :  { %v94_v46 = vmul.f32 %v92_v41, %v90_v43 }
 0x16b   :  { %v93_v45 = vsub.f32 %v87_v42, %v67_v40 }
 0x16d   :  { %v95_v47 = vmul.f32 %v93_v45, %v91_v44 }
 0x16f   :  { %v96_v48 = vadd.f32 %v95_v47, %v94_v46 }
 0x171   :  { %v97_v49 = vrot.slane %v96_v48, 4 }
 0x173   :  { %v98_v50 = vadd.f32 %v97_v49, %v96_v48 }
 0x175   :  { %v99_v51 = vrot.slane %v98_v50, 2 }
 0x177   :  { %v100_v52 = vadd.f32 %v99_v51, %v98_v50 }
 0x179   :  { %v101_v53 = vrot.slane %v100_v52, 1 }
 0x17b   :  { %v102_v54 = vadd.f32 %v101_v53, %v100_v52 }
 0x17d   :  { %103 = vst [vmem:[#allocation7] sm:$0x1] %v102_v54 }
 0x17e   :  { %200 = shalt.err (!%p197_p6)
}
 0x17f   :  { %s201_s11 = scalar_lea.hbm %s275_s2, 16 }
 0x180   :  { %p202_p7 = scmp.ne.s32.totalorder %s275_s2, %s201_s11  ;;  %p205_p8 = scmp.lt.u32.totalorder %s201_s11, %s275_s2 }
 0x182   :  { %p207_p9 = pnand %p205_p8, %p202_p7 }
 0x184   :  { %210 = shalt.err (!%p207_p9)
}
 0x185   :  { %113 = dma.vmem_to_hbm [thread:$0]  %s111_s6, 16, %s275_s2, [#allocation4]  }
 0x186   :  { %215 = dma.done.wait [#allocation4], 16  }
 0x187   :  { %216 = vsyncadd [#allocation4], 4294967280 }
 0x188   :  { %117 = vsyncpa [#allocation3], 1 }
 0x189   :  { %118 = vsyncpa [#allocation6], 1 }
 0x18a   :  { %119 = vsyncpa [#allocation4], 1 }

</bundles_post_ra>
